<compile_context>
chip_gen: v6e
topology: v6e:2x2x1
jax: 0.10.0
libtpu: 0.0.40
codegen_flags: <defaults>
</compile_context>

<pallas_src>
import functools

import jax
import jax.numpy as jnp
from jax.experimental import pallas as pl
from jax.experimental.pallas import tpu as pltpu

GAMMA = 1e-10
LANE = 128
SUBLANE = 8
DEFAULT_BLOCK_ROWS = 8192          # 8192 * 128 * 4 B = 4 MiB per f32 input tile
MAX_BLOCK_ROWS = 16384
_VMEM_BUDGET = 44 << 20            # keep total well below v7x's 64 MiB per-TC VMEM
_VMEM_MARGIN = 4 << 20


def _round_up(x, m):
    return (x + m - 1) // m * m


def _cdiv(a, b):
    return -(-a // b)


def _neg_log_sigmoid(pos, neg):
    diff = pos.astype(jnp.float32) - neg.astype(jnp.float32)
    # sigmoid(x) = 0.5 * tanh(0.5 * x) + 0.5  ->  tanh + log = 2 EUP ops/elem
    sig = 0.5 * jnp.tanh(0.5 * diff) + 0.5
    return -jnp.log(GAMMA + sig)


def _bpr_elem_kernel(pos_ref, neg_ref, loss_ref):
    """mean=False path: element-wise loss only, no reduction work."""
    loss_ref[...] = _neg_log_sigmoid(pos_ref[...], neg_ref[...]).astype(loss_ref.dtype)


def _bpr_partial_sum_kernel(pos_ref, neg_ref, psum_ref, *, valid_rows_last):
    """mean=True path: lane-dense (8, 128) per-block partial sum.

    pos_ref/neg_ref: (tm, 128) tiles; psum_ref: (1, 8, 128) per-block sums.
    valid_rows_last (static Python int or None): number of valid rows in the
    LAST grid block; None means every block is fully in-bounds.
    """
    elem = _neg_log_sigmoid(pos_ref[...], neg_ref[...])          # (tm, 128) f32
    tm = elem.shape[0]

    def block_sum(x):
        # (tm,128)->(tm/8,8,128) splits exactly at the (8,128) tile boundary
        # (layout-preserving), so the axis-0 sum is pure VPU vreg adds; the
        # final cross-lane reduce happens once in the wrapper.
        return jnp.sum(x.reshape(tm // SUBLANE, SUBLANE, LANE), axis=0)

    psum_ref[0] = block_sum(elem)

    if valid_rows_last is not None:
        # Only the last block can contain out-of-bounds (garbage) rows; mask
        # them there and nowhere else (hot path stays mask-free).
        @pl.when(pl.program_id(0) == pl.num_programs(0) - 1)
        def _():
            row = jax.lax.broadcasted_iota(jnp.int32, elem.shape, 0)
            psum_ref[0] = block_sum(jnp.where(row < valid_rows_last, elem, 0.0))


def _vmem_limit(per_row_bytes, tm):
    need = per_row_bytes * tm + _VMEM_MARGIN
    return int(min(max(need, 16 << 20), 48 << 20))


def bpr_loss(pos_score, neg_score, mean=True, *, block_rows=DEFAULT_BLOCK_ROWS):
    """Pallas BPR loss for arbitrary (equal-shaped) inputs."""
    assert pos_score.shape == neg_score.shape
    orig_shape = pos_score.shape
    in_dtype = pos_score.dtype
    out_dtype = in_dtype if jnp.issubdtype(in_dtype, jnp.floating) else jnp.float32
    n = int(pos_score.size)
    if n == 0:
        if mean:
            return jnp.asarray(jnp.nan, dtype=out_dtype)
        return jnp.zeros(orig_shape, dtype=out_dtype)

    in_itemsize = jnp.dtype(in_dtype).itemsize
    out_itemsize = jnp.dtype(out_dtype).itemsize
    # Native sublane packing: 8 rows for 32-bit, 16 for bf16, 32 for int8/fp8.
    sub = max(SUBLANE, SUBLANE * (4 // max(in_itemsize, 1)))

    rows = _cdiv(n, LANE)
    pad = rows * LANE - n
    pos_flat = pos_score.reshape(-1)
    neg_flat = neg_score.reshape(-1)
    if pad:  # only for a ragged tail; aligned inputs stream straight through
        pos_flat = jnp.pad(pos_flat, (0, pad))
        neg_flat = jnp.pad(neg_flat, (0, pad))
    pos2d = pos_flat.reshape(rows, LANE)
    neg2d = neg_flat.reshape(rows, LANE)

    # Per-row VMEM cost: double-buffered inputs (+ output for mean=False) plus
    # headroom for ~4 full-tile f32 intermediates inside the kernel.
    per_row = 2 * 2 * in_itemsize * LANE + 4 * 4 * LANE
    if not mean:
        per_row += 2 * out_itemsize * LANE

    tm_cap = max(sub, ((_VMEM_BUDGET - _VMEM_MARGIN) // per_row) // sub * sub)
    tm = min(_round_up(block_rows, sub), MAX_BLOCK_ROWS, tm_cap)
    if rows <= tm:
        tm = _round_up(rows, sub)       # single (possibly partial) block
    grid_n = _cdiv(rows, tm)
    last_rows = rows - (grid_n - 1) * tm
    vmem_limit = _vmem_limit(per_row, tm)

    if mean:
        kernel = functools.partial(
            _bpr_partial_sum_kernel,
            valid_rows_last=(last_rows if last_rows != tm else None))
        partials = pl.pallas_call(
            kernel,
            out_shape=jax.ShapeDtypeStruct((grid_n, SUBLANE, LANE), jnp.float32),
            grid=(grid_n,),
            in_specs=[pl.BlockSpec((tm, LANE), lambda i: (i, 0)),
                      pl.BlockSpec((tm, LANE), lambda i: (i, 0))],
            out_specs=pl.BlockSpec((1, SUBLANE, LANE), lambda i: (i, 0, 0)),
            compiler_params=pltpu.CompilerParams(
                dimension_semantics=("parallel",),   # independent blocks -> both TCs on v7x
                vmem_limit_bytes=vmem_limit),
        )(pos2d, neg2d)
        total = jnp.sum(partials)                    # tiny final reduce
        if pad:
            # Each zero-padded tail element contributes exactly -log(gamma + 0.5).
            total = total - jnp.float32(pad) * (
                -jnp.log(jnp.float32(GAMMA) + jnp.float32(0.5)))
        # Like torch, .mean() keeps the input floating dtype.
        return (total / jnp.float32(n)).astype(out_dtype)

    # mean=False: stream the element-wise loss, input dtype, no accumulator.
    loss = pl.pallas_call(
        _bpr_elem_kernel,
        out_shape=jax.ShapeDtypeStruct((rows, LANE), out_dtype),
        grid=(grid_n,),
        in_specs=[pl.BlockSpec((tm, LANE), lambda i: (i, 0)),
                  pl.BlockSpec((tm, LANE), lambda i: (i, 0))],
        out_specs=pl.BlockSpec((tm, LANE), lambda i: (i, 0)),
        compiler_params=pltpu.CompilerParams(
            dimension_semantics=("parallel",),
            vmem_limit_bytes=vmem_limit),
    )(pos2d, neg2d)
    if pad:
        loss = loss.reshape(-1)[:n]
    return loss.reshape(orig_shape)


def bpr_loss_ref(pos_score, neg_score, mean=True):
    loss = -jnp.log(GAMMA + jax.nn.sigmoid(
        pos_score.astype(jnp.float32) - neg_score.astype(jnp.float32)))
    return loss.mean().astype(pos_score.dtype) if mean else loss.astype(pos_score.dtype)


if __name__ == "__main__":
    key = jax.random.PRNGKey(0)
    k1, k2, k3, k4 = jax.random.split(key, 4)

    # batch=8 "users", 128 sampled item pairs each -> (8, 128) scores.
    pos = jax.random.normal(k1, (8, 128), dtype=jnp.float32)
    neg = jax.random.normal(k2, (8, 128), dtype=jnp.float32)
    out_mean = jax.block_until_ready(bpr_loss(pos, neg, mean=True))
    out_elem = jax.block_until_ready(bpr_loss(pos, neg, mean=False))
    ref_mean = bpr_loss_ref(pos, neg, mean=True)
    ref_elem = bpr_loss_ref(pos, neg, mean=False)
    assert out_elem.shape == pos.shape
    assert jnp.allclose(out_mean, ref_mean, rtol=1e-5, atol=1e-5), (out_mean, ref_mean)
    assert jnp.allclose(out_elem, ref_elem, rtol=1e-5, atol=1e-5)

    # Ragged shape (not a multiple of 128): pad + constant-correction path.
    pos_r = jax.random.normal(k3, (3, 70), dtype=jnp.float32)
    neg_r = jax.random.normal(k4, (3, 70), dtype=jnp.float32)
    out_mean_r = jax.block_until_ready(bpr_loss(pos_r, neg_r, mean=True))
    out_elem_r = jax.block_until_ready(bpr_loss(pos_r, neg_r, mean=False))
    ref_mean_r = bpr_loss_ref(pos_r, neg_r, mean=True)
    ref_elem_r = bpr_loss_ref(pos_r, neg_r, mean=False)
    assert out_elem_r.shape == pos_r.shape
    assert jnp.allclose(out_mean_r, ref_mean_r, rtol=1e-5, atol=1e-5), (out_mean_r, ref_mean_r)
    assert jnp.allclose(out_elem_r, ref_elem_r, rtol=1e-5, atol=1e-5)

    # Multi-block grid with a partial last block (small block_rows to keep the
    # test tiny): rows=50, tm=16 -> grid=4, last block has only 2 valid rows.
    pos_m = jax.random.normal(k1, (50, 128), dtype=jnp.float32)
    neg_m = jax.random.normal(k2, (50, 128), dtype=jnp.float32)
    out_mean_m = jax.block_until_ready(bpr_loss(pos_m, neg_m, mean=True, block_rows=16))
    out_elem_m = jax.block_until_ready(bpr_loss(pos_m, neg_m, mean=False, block_rows=16))
    ref_mean_m = bpr_loss_ref(pos_m, neg_m, mean=True)
    ref_elem_m = bpr_loss_ref(pos_m, neg_m, mean=False)
    assert jnp.allclose(out_mean_m, ref_mean_m, rtol=1e-5, atol=1e-5), (out_mean_m, ref_mean_m)
    assert jnp.allclose(out_elem_m, ref_elem_m, rtol=1e-5, atol=1e-5)

    print("KERNEL_OK")
</pallas_src>

<mosaic_0001>
module attributes {stable_mosaic.version = 11 : i64} {
  func.func @_bpr_partial_sum_kernel(%arg0: i32, %arg1: memref<8x128xf32, #tpu.memory_space<vmem>>, %arg2: memref<8x128xf32, #tpu.memory_space<vmem>>, %arg3: memref<1x8x128xf32, #tpu.memory_space<vmem>>) attributes {dimension_semantics = [#tpu.dimension_semantics<parallel>], iteration_bounds = array<i64: 1>, scalar_prefetch = 0 : i64, scratch_operands = 0 : i64, tpu.core_type = #tpu.core_type<tc>, window_params = [{transform_indices = @transform_0, window_bounds = array<i64: 8, 128>}, {transform_indices = @transform_1, window_bounds = array<i64: 8, 128>}, {transform_indices = @transform_2, window_bounds = array<i64: 1, 8, 128>}]} {
    %c0 = arith.constant 0 : index
    %c0_0 = arith.constant 0 : index
    %0 = vector.load %arg1[%c0, %c0_0] : memref<8x128xf32, #tpu.memory_space<vmem>>, vector<8x128xf32>
    %c0_1 = arith.constant 0 : index
    %c0_2 = arith.constant 0 : index
    %1 = vector.load %arg2[%c0_1, %c0_2] : memref<8x128xf32, #tpu.memory_space<vmem>>, vector<8x128xf32>
    %2 = arith.subf %0, %1 : vector<8x128xf32>
    %cst = arith.constant 5.000000e-01 : f32
    %3 = vector.broadcast %cst : f32 to vector<8x128xf32>
    %4 = arith.mulf %3, %2 : vector<8x128xf32>
    %5 = math.tanh %4 : vector<8x128xf32>
    %cst_3 = arith.constant 5.000000e-01 : f32
    %6 = vector.broadcast %cst_3 : f32 to vector<8x128xf32>
    %7 = arith.mulf %6, %5 : vector<8x128xf32>
    %cst_4 = arith.constant 5.000000e-01 : f32
    %8 = vector.broadcast %cst_4 : f32 to vector<8x128xf32>
    %9 = arith.addf %7, %8 : vector<8x128xf32>
    %cst_5 = arith.constant 1.000000e-10 : f32
    %10 = vector.broadcast %cst_5 : f32 to vector<8x128xf32>
    %11 = arith.addf %10, %9 : vector<8x128xf32>
    %12 = math.log %11 : vector<8x128xf32>
    %cst_6 = arith.constant 0.000000e+00 : f32
    %13 = vector.broadcast %cst_6 : f32 to vector<8x128xf32>
    %14 = arith.subf %13, %12 : vector<8x128xf32>
    %15 = vector.shape_cast %14 : vector<8x128xf32> to vector<1x8x128xf32>
    %cst_7 = arith.constant dense<0.000000e+00> : vector<8x128xf32>
    %16 = vector.multi_reduction <add>, %15, %cst_7 [0] : vector<1x8x128xf32> to vector<8x128xf32>
    %c0_8 = arith.constant 0 : index
    %c0_9 = arith.constant 0 : index
    %c0_10 = arith.constant 0 : index
    %17 = vector.load %arg3[%c0_8, %c0_9, %c0_10] : memref<1x8x128xf32, #tpu.memory_space<vmem>>, vector<1x8x128xf32>
    %18 = vector.shape_cast %17 : vector<1x8x128xf32> to vector<8x128xf32>
    %19 = vector.shape_cast %16 : vector<8x128xf32> to vector<1x8x128xf32>
    tpu.vector_store %arg3[%c0_8, %c0_9, %c0_10], %19 {strides = array<i32>} : memref<1x8x128xf32, #tpu.memory_space<vmem>>, vector<1x8x128xf32>,
    return
  }
  func.func @transform_0(%arg0: i32) -> (i32, i32) {
    %c0_i32 = arith.constant 0 : i32
    %c0_i32_0 = arith.constant 0 : i32
    return %arg0, %c0_i32 : i32, i32
  }
  func.func @transform_1(%arg0: i32) -> (i32, i32) {
    %c0_i32 = arith.constant 0 : i32
    %c0_i32_0 = arith.constant 0 : i32
    return %arg0, %c0_i32 : i32, i32
  }
  func.func @transform_2(%arg0: i32) -> (i32, i32, i32) {
    %c0_i32 = arith.constant 0 : i32
    %c0_i32_0 = arith.constant 0 : i32
    %c0_i32_1 = arith.constant 0 : i32
    return %arg0, %c0_i32, %c0_i32_0 : i32, i32, i32
  }
}

</mosaic_0001>

<bundles_post_ra>
// kernel: tpu_custom_call.1
= control target key start
LH: loop header
LB: loop body
LE: loop exit
PB: predicated region body
PF: predicated region fallthrough
CT: control target
= control target key end

     0   :  { %7 = vsyncpa [#allocation3], 0  ;;  %s165_s0 = inlined_call_operand.hbm [shape: f32[8,128], index: 0, kind: input, shape index: {}]   ;;  %s166_s1 = inlined_call_operand.hbm [shape: f32[8,128], index: 1, kind: input, shape index: {}]   ;;  %s167_s2 = inlined_call_operand.hbm [shape: f32[1,8,128], index: 2, kind: output, shape index: {}]  }
   0x1   :  { %8 = vsyncpa [#allocation6], 0 }
   0x2   :  { %9 = vsyncpa [#allocation4], 0  ;;  %s138_s9 = smov [#allocation2]   ;;  %s139_s11 = smov [#allocation5]  }
   0x3   :  { %s16_s10 = sshll.u32 %s138_s9, 4  ;;  %s26_s12 = sshll.u32 %s139_s11, 4  ;;  %s17_s10 = int_to_ptr.vmem [resolvable:$true] %s16_s10  ;;  %s27_s12 = int_to_ptr.vmem [resolvable:$true] %s26_s12 }
   0x4   :  { %s80_s13 = scalar_lea.vmem %s17_s10, 128  ;;  %p85_p1 = scmp.lt.s32.totalorder %s17_s10, %s17_s10 }
   0x5   :  { %p81_p0 = scmp.ne.s32.totalorder %s17_s10, %s80_s13  ;;  %p86_p2 = scmp.lt.s32.totalorder %s80_s13, %s80_s13 }
   0x7   :  { %p87_p3 = por %p86_p2, %p85_p1 }
   0x9   :  { %p88_p4 = pnand %p87_p3, %p81_p0 }
   0xb   :  { %91 = shalt.err (!%p88_p4)
}
   0xc   :  { %19 = dma.hbm_to_vmem [thread:$0]  %s165_s0, 128, %s17_s10, [#allocation3]  }
   0xd   :  { %s100_s16 = scalar_lea.vmem %s27_s12, 128  ;;  %p105_p6 = scmp.lt.s32.totalorder %s27_s12, %s27_s12 }
   0xe   :  { %p101_p5 = scmp.ne.s32.totalorder %s27_s12, %s100_s16  ;;  %p106_p7 = scmp.lt.s32.totalorder %s100_s16, %s100_s16 }
  0x10   :  { %p107_p8 = por %p106_p7, %p105_p6 }
  0x12   :  { %p108_p9 = pnand %p107_p8, %p101_p5 }
  0x14   :  { %111 = shalt.err (!%p108_p9)
}
  0x15   :  { %29 = dma.hbm_to_vmem [thread:$0]  %s166_s1, 128, %s27_s12, [#allocation6]  }
  0x16   :  { %132 = dma.done.wait [#allocation3], 128  }
  0x17   :  { %133 = vsyncadd [#allocation3], 4294967168 }
  0x18   :  { %134 = dma.done.wait [#allocation6], 128  }
  0x19   :  { %135 = vsyncadd [#allocation6], 4294967168  ;;  %v36_v0 = vld [vmem:[#allocation2] sm:$0xff]  ;;  %v37_v1 = vld [vmem:[#allocation5] sm:$0xff]  ;;  %s140_s0 = smov [#allocation7]  }
  0x1a   :  { %v38_v2 = vsub.f32 %v36_v0, %v37_v1  ;;  %s55_s19 = sshll.u32 %s140_s0, 4  ;;  %s56_s19 = int_to_ptr.vmem [resolvable:$true] %s55_s19 }
  0x1b   :  { %s112_s1 = scalar_lea.vmem %s56_s19, 128  ;;  %p117_p11 = scmp.lt.s32.totalorder %s56_s19, %s56_s19 }
  0x1c   :  { %v39_v3 = vmul.f32 0.5, %v38_v2  ;;  %p113_p10 = scmp.ne.s32.totalorder %s56_s19, %s112_s1  ;;  %p118_p12 = scmp.lt.s32.totalorder %s112_s1, %s112_s1 }
  0x1e   :  { %68 = vtanh.f32 %v39_v3  ;;  %p119_p13 = por %p118_p12, %p117_p11 }
  0x20   :  { %p120_p0 = pnand %p119_p13, %p113_p10 }
  0x2b   :  { %v69_v4 = vpop.eup %68 }
  0x2c   :  { %v41_v5 = vmul.f32 0.5, %v69_v4 }
  0x2e   :  { %v42_v6 = vadd.f32 0.5, %v41_v5 }
  0x30   :  { %v43_v7 = vadd.f32 1e-10, %v42_v6 }
  0x32   :  { %70 = vlog2.f32 %v43_v7 }
  0x3f   :  { %v71_v8 = vpop.eup %70 }
  0x40   :  { %v45_v9 = vmul.f32 0.6931472, %v71_v8 }
  0x42   :  { %v46_v10 = vsub.f32 0.0, %v45_v9 }
  0x44   :  { %48 = vst [vmem:[#allocation7] sm:$0xff] %v46_v10 }
  0x45   :  { %123 = shalt.err (!%p120_p0)
}
  0x46   :  { %58 = dma.vmem_to_hbm [thread:$0]  %s56_s19, 128, %s167_s2, [#allocation4]  }
  0x47   :  { %136 = dma.done.wait [#allocation4], 128  }
  0x48   :  { %137 = vsyncadd [#allocation4], 4294967168 }
  0x49   :  { %62 = vsyncpa [#allocation3], 1 }
  0x4a   :  { %63 = vsyncpa [#allocation6], 1 }
  0x4b   :  { %64 = vsyncpa [#allocation4], 1 }

</bundles_post_ra>
